<compile_context>
chip_gen: v5e
topology: v5e:2x2
jax: 0.10.0
libtpu: 0.0.40
codegen_flags: <defaults>
</compile_context>

<pallas_src>
import jax
import jax.numpy as jnp
from jax import lax
from jax.experimental import pallas as pl
from jax.experimental.pallas import tpu as pltpu


def _round_up(x, m):
    return ((x + m - 1) // m) * m


# ----------------------------------------------------------------------------
# Kernel 1: conv as ONE dense matmul per M tile (taps folded into K).
# grid = (M_tiles,).  Weights/bias blocks are the full arrays -> VMEM resident.
# ----------------------------------------------------------------------------
def _conv_mm_kernel(cols_ref, w_ref, b_ref, o_ref):
    acc = jnp.dot(cols_ref[...], w_ref[...], preferred_element_type=jnp.float32)
    o_ref[...] = (acc + b_ref[...]).astype(o_ref.dtype)


def conv3d_pallas(x, w, b, stride, *, tile_m=512, dot_dtype=None):
    """x: (N, D, H, W, Cin); w: (kd, kh, kw, Cin, Cout); b: (Cout,)."""
    N, D, H, W, Cin = x.shape
    kd, kh, kw, _, Cout = w.shape
    p = (kd - 1) // 2
    Do = (D + 2 * p - kd) // stride + 1
    Ho = (H + 2 * p - kh) // stride + 1
    Wo = (W + 2 * p - kw) // stride + 1
    M = N * Do * Ho * Wo
    K = kd * kh * kw * Cin

    xp = jnp.pad(x, ((0, 0), (p, p), (p, p), (p, p), (0, 0)))

    # Glue: im2col with the taps concatenated along the channel (K) axis, so the
    # kernel does a single lane/K-dense matmul per tile.
    # TODO(synk): this still materializes an im2col slab in HBM (~k^3/stride^3 x
    # the input volume).  A halo-DMA variant (memory_space=pl.ANY +
    # make_async_copy over overlapping depth windows, taps sliced in VMEM) would
    # cut HBM traffic to ~1-2x; kept to the robust auto-pipelined path here.
    taps = []
    for a in range(kd):
        for bb in range(kh):
            for c in range(kw):
                sl = lax.slice(
                    xp,
                    (0, a, bb, c, 0),
                    (N,
                     a + stride * (Do - 1) + 1,
                     bb + stride * (Ho - 1) + 1,
                     c + stride * (Wo - 1) + 1,
                     Cin),
                    (1, stride, stride, stride, 1))
                taps.append(sl.reshape(M, Cin))
    cols = jnp.concatenate(taps, axis=1)                 # (M, K), tap-major / Cin-minor
    wr = w.reshape(K, Cout)                              # matches tap ordering
    b2 = b.reshape(1, Cout).astype(jnp.float32)

    if dot_dtype is not None:                            # optional bf16 MXU path (v5e/v6e)
        cols = cols.astype(dot_dtype)
        wr = wr.astype(dot_dtype)

    tm = min(tile_m, _round_up(M, 8))
    Mpad = _round_up(M, tm)
    if Mpad != M:
        cols = jnp.pad(cols, ((0, Mpad - M), (0, 0)))

    out = pl.pallas_call(
        _conv_mm_kernel,
        out_shape=jax.ShapeDtypeStruct((Mpad, Cout), x.dtype),
        grid_spec=pltpu.PrefetchScalarGridSpec(
            num_scalar_prefetch=0,
            grid=(Mpad // tm,),
            in_specs=[
                pl.BlockSpec((tm, K), lambda i: (i, 0)),     # streamed M tiles
                pl.BlockSpec((K, Cout), lambda i: (0, 0)),   # weights resident in VMEM
                pl.BlockSpec((1, Cout), lambda i: (0, 0)),   # bias resident in VMEM
            ],
            out_specs=pl.BlockSpec((tm, Cout), lambda i: (i, 0)),
        ),
        compiler_params=pltpu.CompilerParams(
            dimension_semantics=("parallel",)),
    )(cols, wr, b2)
    return out[:M].reshape(N, Do, Ho, Wo, Cout)


# ----------------------------------------------------------------------------
# Kernel 2a: per-(sample, channel) sum / sum-of-squares, tiled over space.
# grid = (N, S_tiles); the S axis is a reduction axis (last, "arbitrary") and the
# (1, 1, C) output blocks stay VMEM-resident across it (accumulator pattern).
# ----------------------------------------------------------------------------
def _in_stats_kernel(x_ref, sum_ref, sq_ref):
    @pl.when(pl.program_id(1) == 0)
    def _():
        sum_ref[...] = jnp.zeros_like(sum_ref)
        sq_ref[...] = jnp.zeros_like(sq_ref)
    x = x_ref[...].astype(jnp.float32)                       # (1, ts, C)
    sum_ref[...] += jnp.sum(x, axis=1, keepdims=True)
    sq_ref[...] += jnp.sum(x * x, axis=1, keepdims=True)


# ----------------------------------------------------------------------------
# Kernel 2b: normalize + affine + PReLU (alpha=0 -> exact ReLU), tiled over space.
# gamma/beta/mean/rstd are pre-folded into per-sample scale/shift (glue).
# ----------------------------------------------------------------------------
def _in_norm_act_kernel(x_ref, scale_ref, shift_ref, alpha_ref, o_ref):
    x = x_ref[...].astype(jnp.float32)                       # (1, ts, C)
    y = x * scale_ref[...] + shift_ref[...]
    y = jnp.where(y > 0, y, alpha_ref[...] * y)              # PReLU / ReLU
    o_ref[...] = y.astype(o_ref.dtype)


def instance_norm_act_pallas(y, gamma, beta, alpha, *, eps=1e-5, tile_s=512):
    """y: (N, Do, Ho, Wo, C)."""
    N, Do, Ho, Wo, C = y.shape
    S = Do * Ho * Wo
    ts = min(tile_s, _round_up(S, 8))
    Sp = _round_up(S, ts)
    y2 = y.reshape(N, S, C)
    if Sp != S:
        # Zero rows contribute 0 to sum/sumsq; divide by the true S below.
        y2 = jnp.pad(y2, ((0, 0), (0, Sp - S), (0, 0)))
    n_s = Sp // ts

    # Pass 1: statistics.
    ssum, ssq = pl.pallas_call(
        _in_stats_kernel,
        out_shape=(jax.ShapeDtypeStruct((N, 1, C), jnp.float32),
                   jax.ShapeDtypeStruct((N, 1, C), jnp.float32)),
        grid_spec=pltpu.PrefetchScalarGridSpec(
            num_scalar_prefetch=0,
            grid=(N, n_s),
            in_specs=[pl.BlockSpec((1, ts, C), lambda n, s: (n, s, 0))],
            out_specs=[pl.BlockSpec((1, 1, C), lambda n, s: (n, 0, 0)),
                       pl.BlockSpec((1, 1, C), lambda n, s: (n, 0, 0))],
        ),
        compiler_params=pltpu.CompilerParams(
            dimension_semantics=("parallel", "arbitrary")),
    )(y2)

    # Tiny per-(N, C) glue math: fold mean/rstd/gamma/beta into scale & shift.
    mean = ssum[:, 0, :] / S
    var = jnp.maximum(ssq[:, 0, :] / S - mean * mean, 0.0)   # biased variance
    rstd = lax.rsqrt(var + eps)
    scale = (gamma[None, :] * rstd).astype(jnp.float32)      # (N, C)
    shift = (beta[None, :] - mean * scale).astype(jnp.float32)

    # Pass 2: normalize + activation (fully parallel grid).
    out = pl.pallas_call(
        _in_norm_act_kernel,
        out_shape=jax.ShapeDtypeStruct((N, Sp, C), y.dtype),
        grid_spec=pltpu.PrefetchScalarGridSpec(
            num_scalar_prefetch=0,
            grid=(N, n_s),
            in_specs=[
                pl.BlockSpec((1, ts, C), lambda n, s: (n, s, 0)),
                pl.BlockSpec((1, 1, C), lambda n, s: (n, 0, 0)),
                pl.BlockSpec((1, 1, C), lambda n, s: (n, 0, 0)),
                pl.BlockSpec((1, 1), lambda n, s: (0, 0)),
            ],
            out_specs=pl.BlockSpec((1, ts, C), lambda n, s: (n, s, 0)),
        ),
        compiler_params=pltpu.CompilerParams(
            dimension_semantics=("parallel", "parallel")),
    )(y2, scale.reshape(N, 1, C), shift.reshape(N, 1, C),
      jnp.asarray(alpha, jnp.float32).reshape(1, 1))
    return out[:, :S, :].reshape(N, Do, Ho, Wo, C)


# ----------------------------------------------------------------------------
# ConvBlock forward + deterministic parameter init (PyTorch-style defaults).
# ----------------------------------------------------------------------------
def init_conv_block_params(key, in_channels, out_channels, k=3):
    def conv_init(key, cout, cin):
        kw_, kb_ = jax.random.split(key)
        fan_in = cin * k * k * k
        bound = 1.0 / jnp.sqrt(fan_in)
        w = jax.random.uniform(kw_, (cout, cin, k, k, k), jnp.float32,
                               -bound, bound)                # PyTorch OIDHW layout
        b = jax.random.uniform(kb_, (cout,), jnp.float32, -bound, bound)
        return w, b

    k1, k2 = jax.random.split(key)
    w1_pt, b1 = conv_init(k1, out_channels, in_channels)
    w2_pt, b2 = conv_init(k2, out_channels, out_channels)
    return {
        "w1_pt": w1_pt, "b1": b1,
        "w2_pt": w2_pt, "b2": b2,
        # channels-last filter layout (kd, kh, kw, Cin, Cout) for the kernels
        "w1": jnp.transpose(w1_pt, (2, 3, 4, 1, 0)),
        "w2": jnp.transpose(w2_pt, (2, 3, 4, 1, 0)),
        "g1": jnp.ones((out_channels,), jnp.float32),
        "beta1": jnp.zeros((out_channels,), jnp.float32),
        "g2": jnp.ones((out_channels,), jnp.float32),
        "beta2": jnp.zeros((out_channels,), jnp.float32),
        "prelu_alpha": jnp.float32(0.25),                    # nn.PReLU() default
    }


def conv_block_forward(x_ncdhw, params, prelu=True, stride=2):
    # NCDHW at the boundary (PyTorch), channels-last inside the kernels.
    x = jnp.transpose(x_ncdhw, (0, 2, 3, 4, 1))
    alpha = params["prelu_alpha"] if prelu else jnp.float32(0.0)
    y = conv3d_pallas(x, params["w1"], params["b1"], stride=stride)
    y = instance_norm_act_pallas(y, params["g1"], params["beta1"], alpha)
    y = conv3d_pallas(y, params["w2"], params["b2"], stride=1)
    y = instance_norm_act_pallas(y, params["g2"], params["beta2"], alpha)
    return jnp.transpose(y, (0, 4, 1, 2, 3))


# Pure-JAX reference (NCDHW, mirrors the PyTorch module) for a sanity check.
def conv_block_reference(x, params, prelu=True, stride=2):
    def conv(x, w, b, s):
        y = lax.conv_general_dilated(
            x, w, window_strides=(s, s, s), padding=[(1, 1)] * 3,
            dimension_numbers=("NCDHW", "OIDHW", "NCDHW"))
        return y + b.reshape(1, -1, 1, 1, 1)

    def inorm(x, g, bt):
        mean = x.mean(axis=(2, 3, 4), keepdims=True)
        var = jnp.square(x - mean).mean(axis=(2, 3, 4), keepdims=True)
        xn = (x - mean) / jnp.sqrt(var + 1e-5)
        return xn * g.reshape(1, -1, 1, 1, 1) + bt.reshape(1, -1, 1, 1, 1)

    a = params["prelu_alpha"] if prelu else jnp.float32(0.0)
    act = lambda x: jnp.where(x > 0, x, a * x)
    y = act(inorm(conv(x, params["w1_pt"], params["b1"], stride),
                  params["g1"], params["beta1"]))
    y = act(inorm(conv(y, params["w2_pt"], params["b2"], 1),
                  params["g2"], params["beta2"]))
    return y


if __name__ == "__main__":
    key = jax.random.PRNGKey(0)
    kx, kp = jax.random.split(key)

    N, Cin, Cout, D = 2, 4, 8, 8
    x = jax.random.normal(kx, (N, Cin, D, D, D), jnp.float32)   # NCDHW
    params = init_conv_block_params(kp, Cin, Cout)

    out = conv_block_forward(x, params, prelu=True)
    out = jax.block_until_ready(out)
    assert out.shape == (N, Cout, D // 2, D // 2, D // 2), out.shape

    ref = conv_block_reference(x, params, prelu=True)
    max_err = float(jnp.max(jnp.abs(out - ref)))
    assert max_err < 1e-3, f"PReLU path mismatch vs reference: {max_err}"

    out_r = jax.block_until_ready(conv_block_forward(x, params, prelu=False))
    ref_r = conv_block_reference(x, params, prelu=False)
    max_err_r = float(jnp.max(jnp.abs(out_r - ref_r)))
    assert max_err_r < 1e-3, f"ReLU path mismatch vs reference: {max_err_r}"

    print("KERNEL_OK")
</pallas_src>

<mosaic_0001>
module attributes {stable_mosaic.version = 11 : i64} {
  func.func @_conv_mm_kernel(%arg0: i32, %arg1: memref<128x108xf32, #tpu.memory_space<vmem>>, %arg2: memref<108x8xf32, #tpu.memory_space<vmem>>, %arg3: memref<1x8xf32, #tpu.memory_space<vmem>>, %arg4: memref<128x8xf32, #tpu.memory_space<vmem>>) attributes {dimension_semantics = [#tpu.dimension_semantics<parallel>], iteration_bounds = array<i64: 1>, scalar_prefetch = 0 : i64, scratch_operands = 0 : i64, tpu.core_type = #tpu.core_type<tc>, window_params = [{transform_indices = @transform_0, window_bounds = array<i64: 128, 108>}, {pipeline_mode = #tpu.pipeline_mode<synchronous>, transform_indices = @transform_1, window_bounds = array<i64: 108, 8>}, {pipeline_mode = #tpu.pipeline_mode<synchronous>, transform_indices = @transform_2, window_bounds = array<i64: 1, 8>}, {transform_indices = @transform_3, window_bounds = array<i64: 128, 8>}]} {
    %c0 = arith.constant 0 : index
    %c0_0 = arith.constant 0 : index
    %0 = vector.load %arg1[%c0, %c0_0] : memref<128x108xf32, #tpu.memory_space<vmem>>, vector<128x108xf32>
    %c0_1 = arith.constant 0 : index
    %c0_2 = arith.constant 0 : index
    %1 = vector.load %arg2[%c0_1, %c0_2] : memref<108x8xf32, #tpu.memory_space<vmem>>, vector<108x8xf32>
    %cst = arith.constant dense<0.000000e+00> : vector<128x8xf32>
    %2 = tpu.matmul %0, %1, %cst {dimension_numbers = #tpu.dot_dimension_numbers<[1], [0], [0], [1], [0, 0, 1, 1], [], []>} : vector<128x108xf32>, vector<108x8xf32>, vector<128x8xf32> -> vector<128x8xf32>
    %c0_3 = arith.constant 0 : index
    %c0_4 = arith.constant 0 : index
    %3 = vector.load %arg3[%c0_3, %c0_4] : memref<1x8xf32, #tpu.memory_space<vmem>>, vector<1x8xf32>
    %4 = vector.broadcast %3 : vector<1x8xf32> to vector<128x8xf32>
    %5 = arith.addf %2, %4 : vector<128x8xf32>
    %c0_5 = arith.constant 0 : index
    %c0_6 = arith.constant 0 : index
    %6 = vector.load %arg4[%c0_5, %c0_6] : memref<128x8xf32, #tpu.memory_space<vmem>>, vector<128x8xf32>
    tpu.vector_store %arg4[%c0_5, %c0_6], %5 {strides = array<i32>} : memref<128x8xf32, #tpu.memory_space<vmem>>, vector<128x8xf32>,
    return
  }
  func.func @transform_0(%arg0: i32) -> (i32, i32) {
    %c0_i32 = arith.constant 0 : i32
    %c0_i32_0 = arith.constant 0 : i32
    return %arg0, %c0_i32 : i32, i32
  }
  func.func @transform_1(%arg0: i32) -> (i32, i32) {
    %c0_i32 = arith.constant 0 : i32
    %c0_i32_0 = arith.constant 0 : i32
    %c0_i32_1 = arith.constant 0 : i32
    return %c0_i32, %c0_i32_0 : i32, i32
  }
  func.func @transform_2(%arg0: i32) -> (i32, i32) {
    %c0_i32 = arith.constant 0 : i32
    %c0_i32_0 = arith.constant 0 : i32
    %c0_i32_1 = arith.constant 0 : i32
    return %c0_i32, %c0_i32_0 : i32, i32
  }
  func.func @transform_3(%arg0: i32) -> (i32, i32) {
    %c0_i32 = arith.constant 0 : i32
    %c0_i32_0 = arith.constant 0 : i32
    return %arg0, %c0_i32 : i32, i32
  }
}

</mosaic_0001>

<bundles_post_ra>
// kernel: tpu_custom_call.1
= control target key start
LH: loop header
LB: loop body
LE: loop exit
PB: predicated region body
PF: predicated region fallthrough
CT: control target
= control target key end

     0   :  { %vm97_vm0 = vcmask 1043456   ;;  %vm48_vm1 = vcmask 883712   ;;  %vm166_vm2 = vcmask 64512   ;;  %s440_s1 = inlined_call_operand.vmem [shape: f32[108,8], index: 1, kind: input, shape index: {}]   ;;  %s441_s2 = inlined_call_operand.vmem [shape: f32[1,8], index: 2, kind: input, shape index: {}]   ;;  %s442_s0 = inlined_call_operand.vmem [shape: f32[128,108], index: 0, kind: input, shape index: {}]   ;;  %s443_s3 = inlined_call_operand.vmem [shape: f32[128,8], index: 3, kind: output, shape index: {}]  }
   0x1   :  { %v43_v0 = vld [vmem:[%s440_s1 + $0x68] sm:$0xf]  ;;  %v42_v1 = vld [vmem:[%s440_s1 + $0x60] sm:$0xff]  ;;  %v41_v2 = vld [vmem:[%s440_s1 + $0x58] sm:$0xff] }
   0x2   :  { %205 = vmatpush.msk.msra.mxu2 %vm97_vm0, %v43_v0  ;;  %206 = vmatpush.msk.msra.mxu3 %vm97_vm0, %v43_v0  ;;  %v40_v3 = vld [vmem:[%s440_s1 + $0x50] sm:$0xff]  ;;  %v39_v4 = vld [vmem:[%s440_s1 + $0x48] sm:$0xff]  ;;  %v38_v5 = vld [vmem:[%s440_s1 + $0x40] sm:$0xff] }
   0x3   :  { %187 = vmatpush.msk.msra.mxu0 %vm97_vm0, %v43_v0  ;;  %204 = vmatpush.msk.msra.mxu1 %vm97_vm0, %v43_v0  ;;  %v37_v6 = vld [vmem:[%s440_s1 + $0x38] sm:$0xff]  ;;  %v36_v7 = vld [vmem:[%s440_s1 + $0x30] sm:$0xff]  ;;  %v35_v8 = vld [vmem:[%s440_s1 + $0x28] sm:$0xff] }
   0x4   :  { %208 = vmatpush.msra.mxu2 %v42_v1  ;;  %209 = vmatpush.msra.mxu3 %v42_v1  ;;  %v34_v9 = vld [vmem:[%s440_s1 + $0x20] sm:$0xff]  ;;  %v33_v10 = vld [vmem:[%s440_s1 + $0x18] sm:$0xff]  ;;  %v32_v11 = vld [vmem:[%s440_s1 + $0x10] sm:$0xff] }
   0x5   :  { %104 = vmatpush.msra.mxu0 %v42_v1  ;;  %207 = vmatpush.msra.mxu1 %v42_v1  ;;  %v31_v12 = vld [vmem:[%s440_s1 + $0x8] sm:$0xff]  ;;  %v30_v13 = vld [vmem:[%s440_s1] sm:$0xff]  ;;  %v24_v22 = vld [vmem:[%s442_s0 + $0x50] sm:$0xff] }
   0x6   :  { %211 = vmatpush.msra.mxu2 %v41_v2  ;;  %212 = vmatpush.msra.mxu3 %v41_v2  ;;  %v22_v14 = vld [vmem:[%s442_s0 + $0x40] sm:$0xff]  ;;  %v23_v18 = vld [vmem:[%s442_s0 + $0x48] sm:$0xff]  ;;  %v28_v23 = vld [vmem:[%s442_s0 + $0x70] sm:$0xff] }
   0x7   :  { %105 = vmatpush.msra.mxu0 %v41_v2  ;;  %210 = vmatpush.msra.mxu1 %v41_v2  ;;  %v26_v15 = vld [vmem:[%s442_s0 + $0x60] sm:$0xff]  ;;  %v27_v19 = vld [vmem:[%s442_s0 + $0x68] sm:$0xff]  ;;  %v16_v24 = vld [vmem:[%s442_s0 + $0x10] sm:$0xff] }
   0x8   :  { %214 = vmatpush.msra.mxu2 %v40_v3  ;;  %215 = vmatpush.msra.mxu3 %v40_v3  ;;  %v14_v16 = vld [vmem:[%s442_s0] sm:$0xff]  ;;  %v15_v20 = vld [vmem:[%s442_s0 + $0x8] sm:$0xff]  ;;  %v20_v25 = vld [vmem:[%s442_s0 + $0x30] sm:$0xff] }
   0x9   :  { %106 = vmatpush.msra.mxu0 %v40_v3  ;;  %213 = vmatpush.msra.mxu1 %v40_v3  ;;  %v18_v17 = vld [vmem:[%s442_s0 + $0x20] sm:$0xff]  ;;  %v19_v21 = vld [vmem:[%s442_s0 + $0x28] sm:$0xff]  ;;  %v25_v26 = vld [vmem:[%s442_s0 + $0x58] sm:$0xff] }
   0xa   :  { %217 = vmatpush.msra.mxu2 %v39_v4  ;;  %218 = vmatpush.msra.mxu3 %v39_v4  ;;  %v29_v27 = vld [vmem:[%s442_s0 + $0x78] sm:$0xff]  ;;  %v246_v30 = vld [vmem:[%s441_s2] ss:$0 sm:$0xff] }
   0xb   :  { %107 = vmatpush.msra.mxu0 %v39_v4  ;;  %216 = vmatpush.msra.mxu1 %v39_v4  ;;  %v17_v28 = vld [vmem:[%s442_s0 + $0x18] sm:$0xff] }
   0xc   :  { %220 = vmatpush.msra.mxu2 %v38_v5  ;;  %221 = vmatpush.msra.mxu3 %v38_v5  ;;  %v21_v29 = vld [vmem:[%s442_s0 + $0x38] sm:$0xff] }
   0xd   :  { %108 = vmatpush.msra.mxu0 %v38_v5  ;;  %219 = vmatpush.msra.mxu1 %v38_v5 }
   0xe   :  { %223 = vmatpush.msra.mxu2 %v37_v6  ;;  %224 = vmatpush.msra.mxu3 %v37_v6 }
   0xf   :  { %109 = vmatpush.msra.mxu0 %v37_v6  ;;  %222 = vmatpush.msra.mxu1 %v37_v6 }
  0x10   :  { %226 = vmatpush.msra.mxu2 %v36_v7  ;;  %227 = vmatpush.msra.mxu3 %v36_v7 }
  0x11   :  { %110 = vmatpush.msra.mxu0 %v36_v7  ;;  %225 = vmatpush.msra.mxu1 %v36_v7 }
  0x12   :  { %229 = vmatpush.msra.mxu2 %v35_v8  ;;  %230 = vmatpush.msra.mxu3 %v35_v8 }
  0x13   :  { %111 = vmatpush.msra.mxu0 %v35_v8  ;;  %228 = vmatpush.msra.mxu1 %v35_v8 }
  0x14   :  { %232 = vmatpush.msra.mxu2 %v34_v9  ;;  %233 = vmatpush.msra.mxu3 %v34_v9 }
  0x15   :  { %112 = vmatpush.msra.mxu0 %v34_v9  ;;  %231 = vmatpush.msra.mxu1 %v34_v9 }
  0x16   :  { %235 = vmatpush.msra.mxu2 %v33_v10  ;;  %236 = vmatpush.msra.mxu3 %v33_v10 }
  0x17   :  { %113 = vmatpush.msra.mxu0 %v33_v10  ;;  %234 = vmatpush.msra.mxu1 %v33_v10 }
  0x18   :  { %238 = vmatpush.msra.mxu2 %v32_v11  ;;  %239 = vmatpush.msra.mxu3 %v32_v11 }
  0x19   :  { %114 = vmatpush.msra.mxu0 %v32_v11  ;;  %237 = vmatpush.msra.mxu1 %v32_v11 }
  0x1a   :  { %241 = vmatpush.msra.mxu2 %v31_v12  ;;  %242 = vmatpush.msra.mxu3 %v31_v12 }
  0x1b   :  { %115 = vmatpush.msra.mxu0 %v31_v12  ;;  %240 = vmatpush.msra.mxu1 %v31_v12 }
  0x1c   :  { %244 = vmatpush.msra.mxu2 %v30_v13  ;;  %245 = vmatpush.msra.mxu3 %v30_v13 }
  0x1d   :  { %196 = vmatmul.msk.f32.vlgmr.msra.gmra.mxu2 %vm48_vm1, %v22_v14  ;;  %200 = vmatmul.msk.f32.vlgmr.msra.gmra.mxu3 %vm48_vm1, %v26_v15 }
  0x1e   :  { %116 = vmatpush.msra.mxu0 %v30_v13  ;;  %243 = vmatpush.msra.mxu1 %v30_v13 }
  0x1f   :  { %188 = vmatmul.msk.f32.vlgmr.msra.gmra.mxu0 %vm48_vm1, %v14_v16  ;;  %192 = vmatmul.msk.f32.vlgmr.msra.gmra.mxu1 %vm48_vm1, %v18_v17 }
  0x25   :  { %197 = vmatmul.msk.f32.gmra.mxu2 %vm48_vm1, %v23_v18  ;;  %201 = vmatmul.msk.f32.gmra.mxu3 %vm48_vm1, %v27_v19 }
  0x27   :  { %189 = vmatmul.msk.f32.gmra.mxu0 %vm48_vm1, %v15_v20  ;;  %193 = vmatmul.msk.f32.gmra.mxu1 %vm48_vm1, %v19_v21 }
  0x2d   :  { %198 = vmatmul.msk.f32.gmra.mxu2 %vm48_vm1, %v24_v22  ;;  %202 = vmatmul.msk.f32.gmra.mxu3 %vm48_vm1, %v28_v23 }
  0x2f   :  { %190 = vmatmul.msk.f32.gmra.mxu0 %vm48_vm1, %v16_v24  ;;  %194 = vmatmul.msk.f32.gmra.mxu1 %vm48_vm1, %v20_v25 }
  0x35   :  { %199 = vmatmul.msk.f32.gmra.mxu2 %vm48_vm1, %v25_v26  ;;  %203 = vmatmul.msk.f32.gmra.mxu3 %vm48_vm1, %v29_v27 }
  0x37   :  { %191 = vmatmul.msk.f32.gmra.mxu0 %vm48_vm1, %v17_v28  ;;  %195 = vmatmul.msk.f32.gmra.mxu1 %vm48_vm1, %v21_v29 }
  0x9c   :  { %v118_v31 = vpop.f32.mrf.mxu0  ;;  %v130_v32 = vpop.f32.mrf.mxu1 }
  0x9d   :  { %v119_v33 = vadd.f32 %v246_v30, %v118_v31  ;;  %v131_v34 = vadd.f32 %v246_v30, %v130_v32 }
  0x9f   :  { %167 = vst.msk [vmem:[%s443_s3] sm:$0xff] %vm166_vm2, %v119_v33 }
  0xa0   :  { %171 = vst.msk [vmem:[%s443_s3 + $0x20] sm:$0xff] %vm166_vm2, %v131_v34  ;;  %v142_v35 = vpop.f32.mrf.mxu2  ;;  %v154_v36 = vpop.f32.mrf.mxu3 }
  0xa1   :  { %v143_v37 = vadd.f32 %v246_v30, %v142_v35  ;;  %v155_v38 = vadd.f32 %v246_v30, %v154_v36 }
  0xa3   :  { %175 = vst.msk [vmem:[%s443_s3 + $0x40] sm:$0xff] %vm166_vm2, %v143_v37 }
  0xa4   :  { %179 = vst.msk [vmem:[%s443_s3 + $0x60] sm:$0xff] %vm166_vm2, %v155_v38  ;;  %v121_v39 = vpop.f32.mrf.mxu0  ;;  %v133_v40 = vpop.f32.mrf.mxu1 }
  0xa5   :  { %v122_v41 = vadd.f32 %v246_v30, %v121_v39  ;;  %v134_v42 = vadd.f32 %v246_v30, %v133_v40 }
  0xa7   :  { %168 = vst.msk [vmem:[%s443_s3 + $0x8] sm:$0xff] %vm166_vm2, %v122_v41 }
  0xa8   :  { %172 = vst.msk [vmem:[%s443_s3 + $0x28] sm:$0xff] %vm166_vm2, %v134_v42  ;;  %v145_v43 = vpop.f32.mrf.mxu2  ;;  %v157_v44 = vpop.f32.mrf.mxu3 }
  0xa9   :  { %v146_v45 = vadd.f32 %v246_v30, %v145_v43  ;;  %v158_v46 = vadd.f32 %v246_v30, %v157_v44 }
  0xab   :  { %176 = vst.msk [vmem:[%s443_s3 + $0x48] sm:$0xff] %vm166_vm2, %v146_v45 }
  0xac   :  { %180 = vst.msk [vmem:[%s443_s3 + $0x68] sm:$0xff] %vm166_vm2, %v158_v46  ;;  %v124_v47 = vpop.f32.mrf.mxu0  ;;  %v136_v48 = vpop.f32.mrf.mxu1 }
  0xad   :  { %v125_v49 = vadd.f32 %v246_v30, %v124_v47  ;;  %v137_v50 = vadd.f32 %v246_v30, %v136_v48 }
  0xaf   :  { %169 = vst.msk [vmem:[%s443_s3 + $0x10] sm:$0xff] %vm166_vm2, %v125_v49 }
  0xb0   :  { %173 = vst.msk [vmem:[%s443_s3 + $0x30] sm:$0xff] %vm166_vm2, %v137_v50  ;;  %v148_v51 = vpop.f32.mrf.mxu2  ;;  %v160_v52 = vpop.f32.mrf.mxu3 }
  0xb1   :  { %v149_v53 = vadd.f32 %v246_v30, %v148_v51  ;;  %v161_v54 = vadd.f32 %v246_v30, %v160_v52 }
  0xb3   :  { %177 = vst.msk [vmem:[%s443_s3 + $0x50] sm:$0xff] %vm166_vm2, %v149_v53 }
  0xb4   :  { %181 = vst.msk [vmem:[%s443_s3 + $0x70] sm:$0xff] %vm166_vm2, %v161_v54  ;;  %v127_v55 = vpop.f32.mrf.mxu0  ;;  %v139_v56 = vpop.f32.mrf.mxu1 }
  0xb5   :  { %v128_v57 = vadd.f32 %v246_v30, %v127_v55  ;;  %v140_v58 = vadd.f32 %v246_v30, %v139_v56 }
  0xb7   :  { %170 = vst.msk [vmem:[%s443_s3 + $0x18] sm:$0xff] %vm166_vm2, %v128_v57 }
  0xb8   :  { %174 = vst.msk [vmem:[%s443_s3 + $0x38] sm:$0xff] %vm166_vm2, %v140_v58  ;;  %v151_v59 = vpop.f32.mrf.mxu2  ;;  %v163_v60 = vpop.f32.mrf.mxu3 }
  0xb9   :  { %v152_v61 = vadd.f32 %v246_v30, %v151_v59  ;;  %v164_v62 = vadd.f32 %v246_v30, %v163_v60 }
  0xbb   :  { %178 = vst.msk [vmem:[%s443_s3 + $0x58] sm:$0xff] %vm166_vm2, %v152_v61 }
  0xbc   :  { %182 = vst.msk [vmem:[%s443_s3 + $0x78] sm:$0xff] %vm166_vm2, %v164_v62 }

</bundles_post_ra>
